<compile_context>
chip_gen: v7x
topology: tpu7x:2x2x1
jax: 0.10.0
libtpu: 0.0.40
codegen_flags: <defaults>
</compile_context>

<pallas_src>
import math
import functools

import jax
import jax.numpy as jnp
from jax.experimental import pallas as pl
from jax.experimental.pallas import tpu as pltpu


def make_positional_encoding(seq_len: int, d_model: int) -> jnp.ndarray:
    """Same buffer as the PyTorch module's `pe` (without the leading batch dim)."""
    positions = jnp.arange(seq_len, dtype=jnp.float32)[:, None]               # (S, 1)
    div_term = jnp.exp(
        jnp.arange(0, d_model, 2, dtype=jnp.float32) * (-math.log(10000.0) / d_model)
    )                                                                          # (D/2,)
    angles = positions * div_term                                              # (S, D/2)
    pe = jnp.zeros((seq_len, d_model), dtype=jnp.float32)
    pe = pe.at[:, 0::2].set(jnp.sin(angles))
    pe = pe.at[:, 1::2].set(jnp.cos(angles))
    return pe


def _pe_dropout_kernel(x_ref, pe_ref, o_ref, *, p, seed, rows_per_block, lane_width):
    # x_ref: (1, tr, C); pe_ref: (1, tr, C) or (1, 1, C) (row-broadcast); o_ref: (1, tr, C)
    val = x_ref[...] + pe_ref[...]
    if p > 0.0:                                   # static: the p==0 path is a pure add
        shape = val.shape
        row0 = pl.program_id(0) * rows_per_block
        rows = jax.lax.broadcasted_iota(jnp.int32, shape, 1) + row0
        cols = jax.lax.broadcasted_iota(jnp.int32, shape, 2)
        # Stateless counter-based PRNG: murmur3 fmix32 of the global element
        # index.  Independent of grid/tile choices; works on TPU and interpret.
        h = (rows * lane_width + cols).astype(jnp.uint32)
        h = h * jnp.uint32(0x9E3779B9) + jnp.uint32(seed)
        h = h ^ (h >> 16)
        h = h * jnp.uint32(0x85EBCA6B)
        h = h ^ (h >> 13)
        h = h * jnp.uint32(0xC2B2AE35)
        h = h ^ (h >> 16)
        u24 = (h & jnp.uint32(0x00FFFFFF)).astype(jnp.int32)
        keep = u24 >= jnp.int32(int(p * (1 << 24)))        # integer-domain compare
        scale = jnp.asarray(1.0 / (1.0 - p), dtype=val.dtype)
        val = jnp.where(keep, val * scale, jnp.zeros_like(val))
    o_ref[...] = val.astype(o_ref.dtype)


def _choose_layout(b, s, d, *, max_lane_width=2048, max_block_bytes=2 << 20, itemsize=4):
    """Fold (b, s, d) into (num_blocks, rows_per_block, C) with NO padding.

    C divides the PE period P = s*d (preferring a multiple of 128 for unmasked
    lane-dense stores); rows_per_block prefers multiples of 8 (sublane-dense),
    keeps the block under max_block_bytes, and leaves >=2 grid steps so v7x's
    second TensorCore gets work.
    """
    P = s * d
    N = b * P
    # Lane width: largest multiple of 128 that divides P.
    C = 0
    cand = (min(P, max_lane_width) // 128) * 128
    while cand >= 128:
        if P % cand == 0:
            C = cand
            break
        cand -= 128
    if C == 0:
        # No multiple-of-128 divisor: one full flattened (s*d) row per batch
        # element; PE becomes a single broadcast row.  (s*d*4 bytes per block.)
        C = P
    R = N // C            # total rows of the flattened (R, C) view
    Rp = P // C           # rows of one PE period (1 in the fallback)

    max_rows = max(1, max_block_bytes // (C * itemsize))
    if Rp > 1:
        divs = [t for t in range(1, min(Rp, max_rows) + 1) if Rp % t == 0]
    else:
        divs = [t for t in range(1, min(R, max_rows) + 1) if R % t == 0]
    good = [t for t in divs if R // t >= 2] or divs        # keep >=2 grid steps
    mult8 = [t for t in good if t % 8 == 0]
    tr = max(mult8) if mult8 else max(good)
    tr_pe = tr if Rp > 1 else 1
    return C, R, Rp, tr, tr_pe


def positional_encoding(x, pe, *, dropout_p=0.0, seed=0):
    """x: (B, S, D); pe: (S_max, D).  Returns dropout(x + pe[:S]) (inverted
    dropout scaled by 1/(1-p), like nn.Dropout) with x's shape and dtype."""
    b, s, d = x.shape
    assert pe.shape[0] >= s and pe.shape[1] == d
    P = s * d
    itemsize = x.dtype.itemsize
    C, R, Rp, tr, tr_pe = _choose_layout(b, s, d, itemsize=itemsize)
    nb = R // tr
    pe_blocks = Rp // tr_pe

    # Pure reshapes (layout-preserving collapses/splits) — no pad/slice copies.
    x3 = x.reshape(nb, tr, C)
    pe3 = pe[:s].astype(x.dtype).reshape(pe_blocks, tr_pe, C)

    kernel = functools.partial(
        _pe_dropout_kernel,
        p=float(dropout_p),
        seed=int(seed) & 0xFFFFFFFF,
        rows_per_block=tr,
        lane_width=C,
    )

    if pe_blocks > 1:
        pe_index_map = lambda i: (i % pe_blocks, 0, 0)     # row-periodic PE tile
    else:
        pe_index_map = lambda i: (0, 0, 0)                 # single (broadcast) PE tile

    out = pl.pallas_call(
        kernel,
        out_shape=jax.ShapeDtypeStruct((nb, tr, C), x.dtype),
        grid_spec=pltpu.PrefetchScalarGridSpec(
            num_scalar_prefetch=0,
            grid=(nb,),
            in_specs=[
                pl.BlockSpec((1, tr, C), lambda i: (i, 0, 0)),      # x rows
                pl.BlockSpec((1, tr_pe, C), pe_index_map),          # PE rows
            ],
            out_specs=pl.BlockSpec((1, tr, C), lambda i: (i, 0, 0)),
        ),
        compiler_params=pltpu.CompilerParams(
            dimension_semantics=("parallel",),          # megacore-shardable on v7x
            vmem_limit_bytes=32 * 1024 * 1024,          # ~12 MiB resident worst case
        ),
        cost_estimate=pl.CostEstimate(
            flops=b * P,                                # one add per element (mem-bound)
            transcendentals=0,
            bytes_accessed=(2 * b * P + P) * itemsize,  # x in, out, pe
        ),
    )(x3, pe3)

    return out.reshape(b, s, d)


if __name__ == "__main__":
    # Small deterministic config consistent with the module: d_model=32, seq=8, batch=2.
    d_model, seq_len, batch = 32, 8, 2

    key = jax.random.PRNGKey(0)
    x = jax.random.normal(key, (batch, seq_len, d_model), dtype=jnp.float32)
    pe = make_positional_encoding(seq_len, d_model)
    ref = x + pe[None, :seq_len, :]

    # p = 0 (eval / no-dropout) path: must match the reference exactly.
    out = positional_encoding(x, pe, dropout_p=0.0)
    out = jax.block_until_ready(out)
    assert out.shape == (batch, seq_len, d_model)
    assert jnp.allclose(out, ref, atol=1e-6, rtol=1e-6)

    # p = 0.5 (training) path: kept elements equal ref / (1 - p); drop rate sane.
    # Note: the RNG stream is an in-kernel counter-based hash, not torch's generator.
    p = 0.5
    out_d = jax.block_until_ready(positional_encoding(x, pe, dropout_p=p, seed=1234))
    scaled = ref / (1.0 - p)
    assert jnp.allclose(jnp.where(out_d != 0, out_d, scaled), scaled, atol=1e-5, rtol=1e-5)
    drop_frac = float(jnp.mean((out_d == 0).astype(jnp.float32)))
    assert 0.2 < drop_frac < 0.8, drop_frac

    print("KERNEL_OK")
</pallas_src>

<mosaic_0001>
module attributes {stable_mosaic.version = 11 : i64} {
  func.func @_pe_dropout_kernel(%arg0: i32, %arg1: memref<1x1x256xf32, #tpu.memory_space<vmem>>, %arg2: memref<1x1x256xf32, #tpu.memory_space<vmem>>, %arg3: memref<1x1x256xf32, #tpu.memory_space<vmem>>) attributes {dimension_semantics = [#tpu.dimension_semantics<parallel>], iteration_bounds = array<i64: 2>, scalar_prefetch = 0 : i64, scratch_operands = 0 : i64, tpu.core_type = #tpu.core_type<tc>, window_params = [{transform_indices = @transform_0, window_bounds = array<i64: 1, 1, 256>}, {pipeline_mode = #tpu.pipeline_mode<synchronous>, transform_indices = @transform_1, window_bounds = array<i64: 1, 1, 256>}, {transform_indices = @transform_2, window_bounds = array<i64: 1, 1, 256>}]} {
    %c0 = arith.constant 0 : index
    %c0_0 = arith.constant 0 : index
    %c0_1 = arith.constant 0 : index
    %0 = vector.load %arg1[%c0, %c0_0, %c0_1] : memref<1x1x256xf32, #tpu.memory_space<vmem>>, vector<1x1x256xf32>
    %c0_2 = arith.constant 0 : index
    %c0_3 = arith.constant 0 : index
    %c0_4 = arith.constant 0 : index
    %1 = vector.load %arg2[%c0_2, %c0_3, %c0_4] : memref<1x1x256xf32, #tpu.memory_space<vmem>>, vector<1x1x256xf32>
    %2 = arith.addf %0, %1 : vector<1x1x256xf32>
    %c0_5 = arith.constant 0 : index
    %c0_6 = arith.constant 0 : index
    %c0_7 = arith.constant 0 : index
    %3 = vector.load %arg3[%c0_5, %c0_6, %c0_7] : memref<1x1x256xf32, #tpu.memory_space<vmem>>, vector<1x1x256xf32>
    tpu.vector_store %arg3[%c0_5, %c0_6, %c0_7], %2 {strides = array<i32>} : memref<1x1x256xf32, #tpu.memory_space<vmem>>, vector<1x1x256xf32>,
    return
  }
  func.func @transform_0(%arg0: i32) -> (i32, i32, i32) {
    %c0_i32 = arith.constant 0 : i32
    %c0_i32_0 = arith.constant 0 : i32
    %c0_i32_1 = arith.constant 0 : i32
    return %arg0, %c0_i32, %c0_i32_0 : i32, i32, i32
  }
  func.func @transform_1(%arg0: i32) -> (i32, i32, i32) {
    %c0_i32 = arith.constant 0 : i32
    %c0_i32_0 = arith.constant 0 : i32
    %c0_i32_1 = arith.constant 0 : i32
    %c0_i32_2 = arith.constant 0 : i32
    return %c0_i32, %c0_i32_0, %c0_i32_1 : i32, i32, i32
  }
  func.func @transform_2(%arg0: i32) -> (i32, i32, i32) {
    %c0_i32 = arith.constant 0 : i32
    %c0_i32_0 = arith.constant 0 : i32
    %c0_i32_1 = arith.constant 0 : i32
    return %arg0, %c0_i32, %c0_i32_0 : i32, i32, i32
  }
}

</mosaic_0001>

<bundles_post_ra>
// kernel: tpu_custom_call.1
= control target key start
LH: loop header
LB: loop body
LE: loop exit
PB: predicated region body
PF: predicated region fallthrough
CT: control target
= control target key end

     0   :  { %7 = vsyncpa [#allocation3], 0  ;;  %s594_s0 = inlined_call_operand.hbm [shape: f32[2,1,256], index: 0, kind: input, shape index: {}]   ;;  %s595_s1 = inlined_call_operand.vmem [shape: f32[1,1,256], index: 1, kind: input, shape index: {}]   ;;  %s596_s2 = inlined_call_operand.hbm [shape: f32[2,1,256], index: 2, kind: output, shape index: {}]  }
   0x1   :  { %9 = vsyncpa [#allocation3 + $0x1], 0 }
   0x2   :  { %10 = vsyncpa [#allocation4], 0 }
   0x3   :  { %12 = vsyncpa [#allocation4 + $0x1], 0  ;;  %s430_s9 = smov 0   ;;  %s432_s10 = smov 0  }
   0x4   :  { %s434_s11 = smov 0   ;;  %s436_s12 = smov 0  }
   0x5 LB: > { %s451_s13 = sadd.s32 4294967295, %s411_s12   ;;  %s253_s14 = sadd.s32 4294967294, %s411_s12   ;;  %s411_s12 = sphi %s436_s12, %s611_s12   ;;  %s407_s11 = sphi %s434_s11, %s610_s11   ;;  %s403_s10 = sphi %s432_s10, %s609_s10   ;;  %s399_s9 = sphi %s430_s9, %s608_s9  }
   0x6   : > { %s455_s15 = sadd.s32 1, %s411_s12   ;;  %s25_s16 = sadd.s32 1, %s407_s11 }
   0x7   : > { %s22_s17 = ssub.s32 %s411_s12, %s455_s15  ;;  %p32_p0 = scmp.ne.s32.totalorder %s407_s11, %s403_s10 }
   0x8   : > { %p23_p1 = scmp.eq.s32.totalorder %s22_s17, 0  ;;  %p33_p2 = scmp.eq.s32.totalorder %s411_s12, 0 }
   0x9   : > { %p38_p3 = scmp.ne.s32.totalorder %s403_s10, %s399_s9  ;;  %p39_p4 = scmp.eq.s32.totalorder %s451_s13, 0 }
   0xa   : > { %s467_s18 = scalar_select %p23_p1, %s407_s11, %s25_s16  }
   0xb   : > { %p469_p5 = por %p33_p2, %p32_p0  ;;  %p473_p6 = por %p39_p4, %p38_p3 }
   0xc   : > { %p83_p7 = scmp.eq.s32.totalorder %s451_s13, 1  ;;  %p89_p8 = scmp.eq.s32.totalorder %s253_s14, 1 }
   0xd   : > { %p281_p10 = scmp.lt.s32.totalorder %s411_s12, 2  ;;  %s112_s23 = sand.u32 1, %s407_s11  }
   0xe   : > { %p480_p11 = por %p83_p7, %p32_p0  ;;  %p484_p12 = por %p89_p8, %p38_p3 }
   0xf   : > { %s267_s24 = sshll.u32 %s411_s12, 5  ;;  %s256_s25 = sshll.u32 %s112_s23, 1 }
  0x10   : > { %s600_s21 = scalar_select %p480_p11, 1, 0 }
  0x11   : > { %s601_s22 = scalar_select %p484_p12, 1, 0 }
  0x12   : > { %s493_s28 = scalar_lea.hbm %s594_s0, %s267_s24  ;;  %s116_s29 = scalar_lea.vmem [#allocation2], %s256_s25 }
  0x13   : > { %s124_s30 = sshll.u32 %s116_s29, 4  ;;  %p497_p13 = pnand %p281_p10, %p469_p5  ;;  %s501_s30 = int_to_ptr.vmem [resolvable:$true] %s124_s30 }
  0x14   : > { %s113_s4 = scalar_lea.sflag [#allocation3], %s112_s23  ;;  %s315_s5 = scalar_lea.hbm %s493_s28, 32 }
  0x15   : > { %p316_p2 = scmp.ne.s32.totalorder %s493_s28, %s315_s5  ;;  %p317_p3 = pneg %p497_p13 }
  0x16   : > { %s320_s8 = scalar_lea.hbm %s594_s0, 64  ;;  %p321_p5 = scmp.lt.u32.totalorder %s493_s28, %s594_s0 }
  0x17   : > { %p318_p4 = pnand %p317_p3, %p316_p2  ;;  %p322_p8 = scmp.lt.u32.totalorder %s320_s8, %s315_s5 }
  0x18   : > { %p324_p9 = scmp.lt.u32.totalorder %s315_s5, %s493_s28 }
  0x19   : > { %p319_p7 = pneg %p318_p4  ;;  %p323_p10 = por %p322_p8, %p321_p5 }
  0x1b   : > { %p325_p0 = por %p324_p9, %p323_p10 }
  0x1d   : > { %p326_p1 = pnand %p325_p0, %p319_p7 }
  0x1f   : > { %329 = shalt.err (!%p326_p1)
}
  0x20   : > { %s330_s17 = scalar_lea.vmem %s501_s30, 32  ;;  %s413_s19 = smov [#allocation2]  }
  0x21   : > { %p331_p2 = scmp.ne.s32.totalorder %s501_s30, %s330_s17  ;;  %s335_s23 = sshll.u32 %s413_s19, 4  ;;  %s336_s23 = int_to_ptr.vmem [resolvable:$false] %s335_s23 }
  0x22   : > { %s337_s24 = scalar_lea.vmem %s336_s23, 64  ;;  %p338_p11 = scmp.lt.s32.totalorder %s501_s30, %s336_s23 }
  0x23   : > { %p333_p4 = pnand %p331_p2, %p317_p3  ;;  %p339_p5 = scmp.lt.s32.totalorder %s337_s24, %s330_s17 }
  0x25   : > { %p334_p12 = pneg %p333_p4  ;;  %p340_p8 = por %p339_p5, %p338_p11 }
  0x27   : > { %p341_p9 = pnand %p340_p8, %p334_p12 }
  0x29   : > { %344 = shalt.err (!%p341_p9)
}
  0x2a   : > { %276 = dma.hbm_to_vmem [thread:$0]  (!%p497_p13), %s493_s28, 32, %s501_s30, %s113_s4  }
  0x2b   : > { %p603_p0 = scmp.lt.s32.totalorder %s411_s12, 3  ;;  %p604_p1 = scmp.ge.s32.totalorder %s411_s12, 1 }
  0x2d   : > { %p130_p3 = pnand %p604_p1, %p603_p0 }
  0x2e   : > { %s535_s25 = sand.u32 (!%p130_p3), 1, %s403_s10  }
  0x2f   : > { %133 = sbr.rel (%p130_p3) target bundleno = 81 (0x51), region = 28  ;;  %s260_s26 = sshll.u32 (!%p130_p3), %s535_s25, 1 }
  0x30   : > { %s136_s27 = scalar_lea.sflag (!%p130_p3), [#allocation3], %s535_s25  ;;  %s139_s29 = scalar_lea.vmem (!%p130_p3), [#allocation2], %s260_s26 }
  0x36   : > { %390 = dma.done.wait (%p473_p6), %s136_s27, 32  }
  0x37   : > { %392 = vsyncadd (%p473_p6), %s136_s27, 4294967264  ;;  %v163_v0 = vlaneseq  ;;  %s159_s28 = scalar_lea.vmem [#allocation5], %s260_s26  ;;  %s268_s3 = sshll.u32 %s451_s13, 5  ;;  %v160_v1 = vld [vmem:[%s139_s29] sm:$0x3] }
  0x38   : > { %s183_s30 = sshll.u32 %s159_s28, 4  ;;  %v161_v2 = vld [vmem:[%s595_s1] sm:$0x3]  ;;  %s552_s20 = scalar_lea.hbm %s596_s2, %s268_s3  ;;  %s547_s30 = int_to_ptr.vmem [resolvable:$true] %s183_s30 }
  0x39   : > { %vm165_vm0 = vcmp.lt.s32.totalorder %v163_v0, 256  ;;  %v162_v3 = vadd.f32 %v161_v2, %v160_v1  ;;  %s169_s8 = scalar_lea.sflag [#allocation4], %s535_s25  ;;  %s345_s13 = scalar_lea.vmem %s547_s30, 32 }
  0x3a   : > { %p346_p6 = scmp.ne.s32.totalorder %s547_s30, %s345_s13  ;;  %p605_p11 = scmp.ne.s32.totalorder %s600_s21, 0 }
  0x3b   : > { %167 = vst.msk [vmem:[%s159_s28] sm:$0x3] %vm165_vm0, %v162_v3  ;;  %s414_s14 = smov [#allocation5]  }
  0x3c   : > { %p347_p12 = pnand %p346_p6, %p605_p11  ;;  %s349_s16 = sshll.u32 %s414_s14, 4  ;;  %s350_s16 = int_to_ptr.vmem [resolvable:$false] %s349_s16 }
  0x3d   : > { %s351_s17 = scalar_lea.vmem %s350_s16, 64  ;;  %p352_p7 = scmp.lt.s32.totalorder %s547_s30, %s350_s16 }
  0x3e   : > { %p348_p13 = pneg %p347_p12  ;;  %p353_p10 = scmp.lt.s32.totalorder %s351_s17, %s345_s13 }
  0x40   : > { %p354_p2 = por %p353_p10, %p352_p7 }
  0x42   : > { %p355_p4 = pnand %p354_p2, %p348_p13 }
  0x44   : > { %358 = shalt.err (!%p355_p4)
}
  0x45   : > { %s359_s19 = scalar_lea.hbm %s552_s20, 32  ;;  %s363_s25 = scalar_lea.hbm %s596_s2, 64 }
  0x46   : > { %p360_p5 = scmp.ne.s32.totalorder %s552_s20, %s359_s19  ;;  %p364_p0 = scmp.lt.u32.totalorder %s552_s20, %s596_s2 }
  0x47   : > { %p365_p1 = scmp.lt.u32.totalorder %s363_s25, %s359_s19  ;;  %p367_p6 = scmp.lt.u32.totalorder %s359_s19, %s552_s20 }
  0x48   : > { %p361_p8 = pnand %p360_p5, %p605_p11 }
  0x49   : > { %p366_p3 = por %p365_p1, %p364_p0 }
  0x4a   : > { %p362_p9 = pneg %p361_p8 }
  0x4b   : > { %p368_p12 = por %p367_p6, %p366_p3 }
  0x4d   : > { %p369_p13 = pnand %p368_p12, %p362_p9 }
  0x4f   : > { %372 = shalt.err (!%p369_p13)
}
  0x50   : > { %271 = dma.vmem_to_hbm [thread:$0]  (%p605_p11), %s547_s30, 32, %s552_s20, %s169_s8  }
  0x51 PF: > { %s195_s29 = sand.u32 1, %s399_s9   ;;  %p606_p7 = scmp.ne.s32.totalorder %s601_s22, 0 }
  0x52   : > { %p607_p10 = scmp.ge.s32.totalorder %s411_s12, 2  ;;  %s196_s28 = scalar_lea.sflag [#allocation4], %s195_s29 }
  0x54   : > { %p278_p2 = pnand %p607_p10, %p606_p7 }
  0x56   : > { %394 = dma.done.wait (!%p278_p2), %s196_s28, 32  }
  0x57   : > { %396 = vsyncadd (!%p278_p2), %s196_s28, 4294967264  ;;  %p15_p4 = scmp.ge.s32.totalorder %s455_s15, 4   ;;  %s608_s9 = smov %s403_s10 }
  0x58   : > { %s609_s10 = smov %s407_s11  ;;  %s610_s11 = smov %s467_s18 }
  0x59   : > { %s611_s12 = smov %s455_s15  ;;  %17 = sbr.rel (!%p15_p4) target bundleno = 5 (0x5), region = 73 }
  0x60   :  { %201 = vsyncpa [#allocation3], 1 }
  0x61   :  { %203 = vsyncpa [#allocation3 + $0x1], 1 }
  0x62   :  { %204 = vsyncpa [#allocation4], 1 }
  0x63   :  { %206 = vsyncpa [#allocation4 + $0x1], 1 }

</bundles_post_ra>
